<compile_context>
chip_gen: v7x
topology: tpu7x:2x2x1
jax: 0.10.0
libtpu: 0.0.40
codegen_flags: <defaults>
</compile_context>

<pallas_src>
import jax
import jax.numpy as jnp
from jax.experimental import pallas as pl
from jax.experimental.pallas import tpu as pltpu

LANES = 128
_TARGET_BLOCK_BYTES = 4 * 1024 * 1024   # ~4 MiB of input per grid step
_VMEM_LIMIT_BYTES = 32 * 1024 * 1024    # safe scoped-VMEM ceiling on v5e/v6e/v7x


def _star_relu_kernel(scale_ref, bias_ref, x_ref, o_ref):
    # scale_ref / bias_ref live in SMEM as (1, 1) f32 scalars.
    s = scale_ref[0, 0]
    b = bias_ref[0, 0]
    x = x_ref[...].astype(jnp.float32)                    # compute in f32 on VPU
    r = jnp.maximum(x, 0.0)
    o_ref[...] = (s * (r * r) + b).astype(o_ref.dtype)    # store in input dtype


def star_relu(x, scale, bias):
    """StarReLU: scale * relu(x)**2 + bias, elementwise.

    x:      any-shape array (NCHW in the demo, same semantics as PyTorch).
    scale:  shape (1,) learnable scalar.
    bias:   shape (1,) learnable scalar.
    """
    orig_shape = x.shape
    n = x.size
    if n == 0:
        return x

    # Flatten; pad only to a multiple of LANES (128), and only if needed.
    xf = x.reshape(-1)
    rem = n % LANES
    padded = rem != 0
    if padded:
        xf = jnp.pad(xf, (0, LANES - rem))
    x2d = xf.reshape(-1, LANES)                 # [rows, 128] lane-dense slab
    rows = x2d.shape[0]

    # Large row-block (~4 MiB of input per step), multiple of 8 sublanes.
    elem_bytes = jnp.dtype(x2d.dtype).itemsize
    br = max(8, (_TARGET_BLOCK_BYTES // (LANES * elem_bytes)) // 8 * 8)
    if rows <= br:
        br = rows                               # single full-array block
        grid = (1,)
    else:
        grid = (pl.cdiv(rows, br),)             # ragged last block is masked

    scale2d = scale.reshape(1, 1).astype(jnp.float32)
    bias2d = bias.reshape(1, 1).astype(jnp.float32)

    out2d = pl.pallas_call(
        _star_relu_kernel,
        out_shape=jax.ShapeDtypeStruct((rows, LANES), x2d.dtype),
        grid_spec=pltpu.PrefetchScalarGridSpec(
            num_scalar_prefetch=0,
            grid=grid,
            in_specs=[
                pl.BlockSpec(memory_space=pltpu.MemorySpace.SMEM),  # scale (1,1)
                pl.BlockSpec(memory_space=pltpu.MemorySpace.SMEM),  # bias  (1,1)
                pl.BlockSpec((br, LANES), lambda i: (i, 0)),        # x tile
            ],
            out_specs=pl.BlockSpec((br, LANES), lambda i: (i, 0)),
        ),
        compiler_params=pltpu.CompilerParams(
            dimension_semantics=("parallel",),
            vmem_limit_bytes=_VMEM_LIMIT_BYTES,
        ),
    )(scale2d, bias2d, x2d)

    if padded:
        return out2d.reshape(-1)[:n].reshape(orig_shape)
    return out2d.reshape(orig_shape)


class StarReLUParams:
    """Deterministic parameter init matching the PyTorch module __init__."""

    def __init__(self, scale_value=1.0, bias_value=0.0):
        self.scale = scale_value * jnp.ones((1,), dtype=jnp.float32)
        self.bias = bias_value * jnp.ones((1,), dtype=jnp.float32)

    def __call__(self, x):
        return star_relu(x, self.scale, self.bias)


if __name__ == "__main__":
    key = jax.random.PRNGKey(0)
    k1, k2, k3 = jax.random.split(key, 3)

    mod = StarReLUParams(scale_value=0.8944, bias_value=-0.4472)

    # Test 1: NCHW f32 input, lane-aligned size (fast path, no pad / slice).
    x1 = jax.random.normal(k1, (2, 4, 16, 16), dtype=jnp.float32)
    y1 = jax.block_until_ready(mod(x1))
    ref1 = mod.scale[0] * jnp.maximum(x1, 0.0) ** 2 + mod.bias[0]
    assert y1.shape == x1.shape and y1.dtype == x1.dtype
    assert jnp.allclose(y1, ref1, atol=1e-6, rtol=1e-6)

    # Test 2: ragged element count (exercises the pad / slice path).
    x2 = jax.random.normal(k2, (3, 5, 7, 11), dtype=jnp.float32)
    y2 = jax.block_until_ready(mod(x2))
    ref2 = mod.scale[0] * jnp.maximum(x2, 0.0) ** 2 + mod.bias[0]
    assert y2.shape == x2.shape and y2.dtype == x2.dtype
    assert jnp.allclose(y2, ref2, atol=1e-6, rtol=1e-6)

    # Test 3: bf16 input (compute in f32, store back in bf16).
    x3 = jax.random.normal(k3, (2, 4, 16, 16), dtype=jnp.bfloat16)
    y3 = jax.block_until_ready(mod(x3))
    ref3 = (mod.scale[0] * jnp.maximum(x3.astype(jnp.float32), 0.0) ** 2
            + mod.bias[0]).astype(jnp.bfloat16)
    assert y3.shape == x3.shape and y3.dtype == jnp.bfloat16
    assert jnp.allclose(y3.astype(jnp.float32), ref3.astype(jnp.float32),
                        atol=2e-2, rtol=2e-2)

    print("KERNEL_OK")
</pallas_src>

<mosaic_0001>
module attributes {stable_mosaic.version = 11 : i64} {
  func.func @_star_relu_kernel(%arg0: i32, %arg1: memref<1x1xf32, #tpu.memory_space<smem>>, %arg2: memref<1x1xf32, #tpu.memory_space<smem>>, %arg3: memref<16x128xf32, #tpu.memory_space<vmem>>, %arg4: memref<16x128xf32, #tpu.memory_space<vmem>>) attributes {dimension_semantics = [#tpu.dimension_semantics<parallel>], iteration_bounds = array<i64: 1>, scalar_prefetch = 0 : i64, scratch_operands = 0 : i64, tpu.core_type = #tpu.core_type<tc>, window_params = [{transform_indices = @transform_0, window_bounds = array<i64: 1, 1>}, {transform_indices = @transform_1, window_bounds = array<i64: 1, 1>}, {transform_indices = @transform_2, window_bounds = array<i64: 16, 128>}, {transform_indices = @transform_3, window_bounds = array<i64: 16, 128>}]} {
    %c0 = arith.constant 0 : index
    %c0_0 = arith.constant 0 : index
    %0 = memref.load %arg1[%c0, %c0_0] : memref<1x1xf32, #tpu.memory_space<smem>>
    %c0_1 = arith.constant 0 : index
    %c0_2 = arith.constant 0 : index
    %1 = memref.load %arg2[%c0_1, %c0_2] : memref<1x1xf32, #tpu.memory_space<smem>>
    %c0_3 = arith.constant 0 : index
    %c0_4 = arith.constant 0 : index
    %2 = vector.load %arg3[%c0_3, %c0_4] : memref<16x128xf32, #tpu.memory_space<vmem>>, vector<16x128xf32>
    %cst = arith.constant 0.000000e+00 : f32
    %3 = vector.broadcast %cst : f32 to vector<16x128xf32>
    %4 = arith.maximumf %2, %3 : vector<16x128xf32>
    %5 = arith.mulf %4, %4 : vector<16x128xf32>
    %6 = vector.broadcast %0 : f32 to vector<16x128xf32>
    %7 = arith.mulf %6, %5 : vector<16x128xf32>
    %8 = vector.broadcast %1 : f32 to vector<16x128xf32>
    %9 = arith.addf %7, %8 : vector<16x128xf32>
    %c0_5 = arith.constant 0 : index
    %c0_6 = arith.constant 0 : index
    %10 = vector.load %arg4[%c0_5, %c0_6] : memref<16x128xf32, #tpu.memory_space<vmem>>, vector<16x128xf32>
    tpu.vector_store %arg4[%c0_5, %c0_6], %9 {strides = array<i32>} : memref<16x128xf32, #tpu.memory_space<vmem>>, vector<16x128xf32>,
    return
  }
  func.func @transform_0(%arg0: i32) -> (i32, i32) {
    %c0_i32 = arith.constant 0 : i32
    %c0_i32_0 = arith.constant 0 : i32
    %c0_i32_1 = arith.constant 0 : i32
    return %c0_i32, %c0_i32_0 : i32, i32
  }
  func.func @transform_1(%arg0: i32) -> (i32, i32) {
    %c0_i32 = arith.constant 0 : i32
    %c0_i32_0 = arith.constant 0 : i32
    %c0_i32_1 = arith.constant 0 : i32
    return %c0_i32, %c0_i32_0 : i32, i32
  }
  func.func @transform_2(%arg0: i32) -> (i32, i32) {
    %c0_i32 = arith.constant 0 : i32
    %c0_i32_0 = arith.constant 0 : i32
    return %arg0, %c0_i32 : i32, i32
  }
  func.func @transform_3(%arg0: i32) -> (i32, i32) {
    %c0_i32 = arith.constant 0 : i32
    %c0_i32_0 = arith.constant 0 : i32
    return %arg0, %c0_i32 : i32, i32
  }
}

</mosaic_0001>

<bundles_post_ra>
// kernel: tpu_custom_call.1
= control target key start
LH: loop header
LB: loop body
LE: loop exit
PB: predicated region body
PF: predicated region fallthrough
CT: control target
= control target key end

     0   :  { %10 = vsyncpa [#allocation5], 0  ;;  %s176_s0 = inlined_call_operand.<no memory space> [shape: f32[1,1], index: 0, kind: input, shape index: {}]   ;;  %s177_s1 = inlined_call_operand.<no memory space> [shape: f32[1,1], index: 1, kind: input, shape index: {}]   ;;  %s178_s2 = inlined_call_operand.hbm [shape: f32[16,128], index: 2, kind: input, shape index: {}]   ;;  %s179_s3 = inlined_call_operand.hbm [shape: f32[16,128], index: 3, kind: output, shape index: {}]  }
   0x1   :  { %11 = vsyncpa [#allocation6], 0  ;;  %s116_s12 = smov [#allocation4]   ;;  %s68_s16 = scalar_lea.hbm %s178_s2, 256 }
   0x2   :  { %s21_s13 = sshll.u32 %s116_s12, 4  ;;  %p69_p0 = scmp.ne.s32.totalorder %s178_s2, %s68_s16  ;;  %s22_s13 = int_to_ptr.vmem [resolvable:$true] %s21_s13 }
   0x3   :  { %p72_p1 = scmp.lt.u32.totalorder %s68_s16, %s178_s2 }
   0x5   :  { %p74_p2 = pnand %p72_p1, %p69_p0 }
   0x7   :  { %77 = shalt.err (!%p74_p2)
}
   0x8   :  { %s78_s21 = scalar_lea.vmem %s22_s13, 256  ;;  %p83_p4 = scmp.lt.s32.totalorder %s22_s13, %s22_s13 }
   0x9   :  { %p79_p3 = scmp.ne.s32.totalorder %s22_s13, %s78_s21  ;;  %p84_p5 = scmp.lt.s32.totalorder %s78_s21, %s78_s21 }
   0xb   :  { %p85_p6 = por %p84_p5, %p83_p4 }
   0xd   :  { %p86_p7 = pnand %p85_p6, %p79_p3 }
   0xf   :  { %89 = shalt.err (!%p86_p7)
}
  0x10   :  { %s117_s22 = smov 128   ;;  %s118_s23 = smov 8  }
  0x11   :  { %27 = dma.hbm_to_vmem [thread:$0]  %s178_s2, 256, %s22_s13, [#allocation5], %s117_s22, %s117_s22, %s118_s23  }
  0x12   :  { %112 = dma.done.wait [#allocation5], 256  }
  0x13   :  { %113 = vsyncadd [#allocation5], 4294967040  ;;  %v33_v0 = vld [vmem:[#allocation4] sm:$0xff]  ;;  %v34_v1 = vld [vmem:[#allocation4 + $0x8] sm:$0xff]  ;;  %v39_v4 = vstv %s176_s0  ;;  %v42_v7 = vstv %s177_s1  ;;  %s119_s30 = smov [#allocation7]  }
  0x14   :  { %v35_v2 = vmax.f32 %v33_v0, 0.0  ;;  %v36_v3 = vmax.f32 %v34_v1, 0.0  ;;  %s52_s4 = sshll.u32 %s119_s30, 4  ;;  %s53_s4 = int_to_ptr.vmem [resolvable:$true] %s52_s4 }
  0x15   :  { %s90_s2 = scalar_lea.vmem %s53_s4, 256  ;;  %p95_p9 = scmp.lt.s32.totalorder %s53_s4, %s53_s4 }
  0x16   :  { %v37_v5 = vmul.f32 %v35_v2, %v35_v2  ;;  %v38_v6 = vmul.f32 %v36_v3, %v36_v3  ;;  %p91_p8 = scmp.ne.s32.totalorder %s53_s4, %s90_s2  ;;  %p96_p10 = scmp.lt.s32.totalorder %s90_s2, %s90_s2 }
  0x18   :  { %v40_v8 = vmul.f32 %v39_v4, %v37_v5  ;;  %v41_v9 = vmul.f32 %v39_v4, %v38_v6  ;;  %p97_p11 = por %p96_p10, %p95_p9 }
  0x1a   :  { %v43_v10 = vadd.f32 %v42_v7, %v40_v8  ;;  %v44_v11 = vadd.f32 %v42_v7, %v41_v9  ;;  %p98_p12 = pnand %p97_p11, %p91_p8 }
  0x1c   :  { %45 = vst [vmem:[#allocation7] sm:$0xff] %v43_v10  ;;  %46 = vst [vmem:[#allocation7 + $0x8] sm:$0xff] %v44_v11 }
  0x1d   :  { %101 = shalt.err (!%p98_p12)
}
  0x1e   :  { %s102_s1 = scalar_lea.hbm %s179_s3, 256 }
  0x1f   :  { %p103_p13 = scmp.ne.s32.totalorder %s179_s3, %s102_s1  ;;  %p106_p0 = scmp.lt.u32.totalorder %s102_s1, %s179_s3 }
  0x21   :  { %p108_p1 = pnand %p106_p0, %p103_p13 }
  0x23   :  { %111 = shalt.err (!%p108_p1)
}
  0x24   :  { %58 = dma.vmem_to_hbm [thread:$0]  %s53_s4, 256, %s179_s3, [#allocation6], %s117_s22, %s117_s22, %s118_s23  }
  0x25   :  { %114 = dma.done.wait [#allocation6], 256  }
  0x26   :  { %115 = vsyncadd [#allocation6], 4294967040 }
  0x27   :  { %62 = vsyncpa [#allocation5], 1 }
  0x28   :  { %63 = vsyncpa [#allocation6], 1 }

</bundles_post_ra>
